<compile_context>
chip_gen: v5e
topology: v5e:2x2
jax: 0.10.0
libtpu: 0.0.40
codegen_flags: <defaults>
</compile_context>

<pallas_src>
import functools
from typing import NamedTuple

import numpy as np
import jax
import jax.numpy as jnp
from jax import lax
from jax.experimental import pallas as pl
from jax.experimental.pallas import tpu as pltpu


# ----------------------------- Pallas kernel ------------------------------ #
def _fused_affine_kernel(x_ref, a_ref, c_ref, o_ref):
    # (tb, K) @ (K, n_out) + (1, n_out).  K=81 and n_out=4 are the full array
    # extents (only the batch axis is tiled), so no padded columns are read or
    # written.  The kernel is launch/DMA-bound, not MXU-bound.
    o_ref[...] = (
        jnp.dot(x_ref[...], a_ref[...], preferred_element_type=jnp.float32)
        + c_ref[...]
    )


# --------------------------- weight precomposition ------------------------- #
def _round_up(x, m):
    return (x + m - 1) // m * m


def _affine_chain(x_nchw, p, with_bias):
    """The module's conv+linear chain; biases optionally zeroed."""
    s = 1.0 if with_bias else 0.0

    def conv(x, w, b):
        y = lax.conv_general_dilated(
            x, w, (1, 1), "VALID", dimension_numbers=("NCHW", "OIHW", "NCHW"))
        return y + s * b[None, :, None, None]

    x = conv(x_nchw, p["enc_conv1x1_w"], p["enc_conv1x1_b"])  # encoder.conv1X1
    x = conv(x, p["enc_conv1_w"], p["enc_conv1_b"])           # encoder.conv1
    x = conv(x, p["enc_conv2_w"], p["enc_conv2_b"])           # encoder.conv2
    x = conv(x, p["dec_conv1_w"], p["dec_conv1_b"])           # decoder.conv1
    x = conv(x, p["dec_conv2_w"], p["dec_conv2_b"])           # decoder.conv2
    # decoder.dense_bbx: nn.Linear over the last (spatial W) axis of NCHW.
    y = jnp.einsum("bchw,ow->bcho", x, p["dense_w"]) + s * p["dense_b"]
    return y.reshape(x.shape[0], -1)


class PreparedCNNAutoencoder(NamedTuple):
    A: jax.Array        # (n_in, n_out) fused affine matrix
    c: jax.Array        # (1, n_out)    fused bias
    num_nodes: int
    bbx_size: int
    n_in: int           # num_nodes * H * W
    n_out: int          # num_nodes * bbx_size


def prepare_cnn_autoencoder(params, H, W):
    """Fold all conv layers + the final Linear into (A, c).  Weight prep only:
    depends on the parameters and static shapes, never on X."""
    p = params
    num_nodes = int(p["enc_conv1x1_w"].shape[0])
    bbx_size = int(p["dense_b"].shape[0]) // num_nodes
    n_in = num_nodes * H * W

    # Linear part: bias-free chain applied to all n_in one-hot basis inputs
    # (avoids catastrophic cancellation when composing A).
    basis = jnp.eye(n_in, dtype=jnp.float32).reshape(n_in, num_nodes, H, W)
    A = _affine_chain(basis, p, with_bias=False)                  # (n_in, n_out)
    # Bias part: biases propagated through the chain on a zero input.
    c = _affine_chain(jnp.zeros((1, num_nodes, H, W), jnp.float32), p,
                      with_bias=True)                             # (1, n_out)
    n_out = int(A.shape[1])
    # The module's own final reshape is only shape-consistent when this holds
    # (num_nodes == 1 with 9x9 inputs); fail loudly if the config changes.
    assert n_out == num_nodes * bbx_size, (n_out, num_nodes, bbx_size)
    return PreparedCNNAutoencoder(A, c, num_nodes, bbx_size, n_in, n_out)


# ------------------------------ batch tiling -------------------------------- #
_TB_MAX = 1024  # ~330 KiB x-tile (f32); x2 double-buffer << VMEM on v5e/v6e/v7x


def _select_batch_tile(B):
    if B <= 256:
        # One sublane-aligned tile: a single grid step, minimal launch/DMA
        # overhead (v5e/v6e single-TC preference).
        return _round_up(B, 8)
    if B <= 2 * _TB_MAX:
        # Two tiles: the 'parallel' batch axis is actually sharded across the
        # 2 TensorCores on v7x; still only two grid steps of overhead.
        return _round_up(-(-B // 2), 8)
    # Large batches: fat fixed tiles, far past the ~512-row roofline knee.
    return _TB_MAX


# ------------------------------- forward ----------------------------------- #
@functools.partial(jax.jit, static_argnames=("num_nodes", "bbx_size"))
def _forward_pallas(x_nchw, A, c, *, num_nodes, bbx_size):
    B = x_nchw.shape[0]
    n_in, n_out = A.shape

    # NCHW -> (B, C*H*W) flat layout (C-order; matches the basis used for A).
    x_flat = x_nchw.reshape(B, n_in).astype(jnp.float32)

    tb = _select_batch_tile(B)
    b_pad = _round_up(B, tb)
    grid = (b_pad // tb,)

    if b_pad != B:
        # Only the batch rows are ever padded, and only when needed.
        x_flat = jnp.pad(x_flat, ((0, b_pad - B), (0, 0)))

    out = pl.pallas_call(
        _fused_affine_kernel,
        out_shape=jax.ShapeDtypeStruct((b_pad, n_out), jnp.float32),
        grid=grid,
        in_specs=[
            pl.BlockSpec((tb, n_in), lambda i: (i, 0)),      # x batch tile
            pl.BlockSpec((n_in, n_out), lambda i: (0, 0)),   # fused weights
            pl.BlockSpec((1, n_out), lambda i: (0, 0)),      # fused bias
        ],
        out_specs=pl.BlockSpec((tb, n_out), lambda i: (i, 0)),
        compiler_params=pltpu.CompilerParams(
            dimension_semantics=("parallel",)),               # 2 TCs on v7x
    )(x_flat, A, c)

    if b_pad != B:
        out = out[:B]
    return out.reshape(B, num_nodes, bbx_size)


@functools.partial(jax.jit, static_argnames=("num_nodes", "bbx_size"))
def _forward_xla(x_nchw, A, c, *, num_nodes, bbx_size):
    # Tiny-batch fallback: a plain XLA dot has no kernel-launch overhead and
    # fuses any pad/slice.
    B = x_nchw.shape[0]
    y = x_nchw.reshape(B, A.shape[0]).astype(jnp.float32) @ A + c
    return y.reshape(B, num_nodes, bbx_size)


def cnn_autoencoder_forward(x_nchw, prepared, nodes=None, *, min_pallas_batch=0):
    """Pallas implementation of CNNAutoencoder.forward(X, nodes).

    min_pallas_batch: batches smaller than this use the plain-XLA path
    (recommended ~128 in production); default 0 always runs the Pallas kernel.
    """
    del nodes  # unused by the reference module's forward
    if x_nchw.shape[0] < min_pallas_batch:
        return _forward_xla(x_nchw, prepared.A, prepared.c,
                            num_nodes=prepared.num_nodes,
                            bbx_size=prepared.bbx_size)
    return _forward_pallas(x_nchw, prepared.A, prepared.c,
                           num_nodes=prepared.num_nodes,
                           bbx_size=prepared.bbx_size)


# ------------------------------ reference ---------------------------------- #
def _reference_forward(x, p, num_nodes, bbx_size):
    def conv(x, w, b):
        y = lax.conv_general_dilated(
            x, w, (1, 1), "VALID", dimension_numbers=("NCHW", "OIHW", "NCHW"))
        return y + b[None, :, None, None]

    x = conv(x, p["enc_conv1x1_w"], p["enc_conv1x1_b"])
    x = conv(x, p["enc_conv1_w"], p["enc_conv1_b"])
    x = conv(x, p["enc_conv2_w"], p["enc_conv2_b"])
    x = conv(x, p["dec_conv1_w"], p["dec_conv1_b"])
    x = conv(x, p["dec_conv2_w"], p["dec_conv2_b"])
    # nn.Linear over the last (spatial) axis, as in the reference module;
    # the sigmoid output is computed-but-discarded there, so not applied.
    y = jnp.einsum("bchw,ow->bcho", x, p["dense_w"]) + p["dense_b"]
    return y.reshape(x.shape[0], num_nodes, bbx_size)


# --------------------------------- main ------------------------------------ #
if __name__ == "__main__":
    # Module hyper-params (num_nodes / H / W forced by the module's own reshape).
    latent_dims = 16          # stored but unused by the forward pass
    num_nodes = 1
    bbx_size = 4
    hidden1, hidden2 = 12, 8  # CNNAutoencoder defaults passed to enc & dec
    B, H, W = 2, 9, 9

    key = jax.random.PRNGKey(0)
    ks = jax.random.split(key, 15)

    def init(k, shape):
        return jax.random.normal(k, shape, jnp.float32) * 0.1

    params = {
        "enc_conv1x1_w": init(ks[0], (num_nodes, num_nodes, 1, 1)),
        "enc_conv1x1_b": init(ks[1], (num_nodes,)),
        "enc_conv1_w":   init(ks[2], (hidden1, num_nodes, 3, 3)),
        "enc_conv1_b":   init(ks[3], (hidden1,)),
        "enc_conv2_w":   init(ks[4], (hidden2, hidden1, 3, 3)),
        "enc_conv2_b":   init(ks[5], (hidden2,)),
        "dec_conv1_w":   init(ks[6], (hidden1, hidden2, 3, 3)),
        "dec_conv1_b":   init(ks[7], (hidden1,)),
        "dec_conv2_w":   init(ks[8], (num_nodes, hidden1, 3, 3)),
        "dec_conv2_b":   init(ks[9], (num_nodes,)),
        "dense_w":       init(ks[10], (num_nodes * bbx_size, num_nodes)),
        "dense_b":       init(ks[11], (num_nodes * bbx_size,)),
    }

    X = jax.random.normal(ks[12], (B, num_nodes, H, W), jnp.float32)
    nodes = jax.random.normal(ks[13], (B, num_nodes), jnp.float32)  # unused

    # One-time weight precomposition (independent of X), then the fused kernel.
    prepared = prepare_cnn_autoencoder(params, H, W)

    # Small batch: single-tile Pallas path.
    out = cnn_autoencoder_forward(X, prepared, nodes)
    out = jax.block_until_ready(out)
    ref = _reference_forward(X, params, num_nodes, bbx_size)
    np.testing.assert_allclose(np.asarray(out), np.asarray(ref),
                               rtol=1e-4, atol=1e-5)
    assert out.shape == (B, num_nodes, bbx_size)

    # Larger batch: exercises the multi-tile "parallel" grid path.
    Bbig = 384
    Xbig = jax.random.normal(ks[14], (Bbig, num_nodes, H, W), jnp.float32)
    out_big = jax.block_until_ready(cnn_autoencoder_forward(Xbig, prepared))
    ref_big = _reference_forward(Xbig, params, num_nodes, bbx_size)
    np.testing.assert_allclose(np.asarray(out_big), np.asarray(ref_big),
                               rtol=1e-4, atol=1e-5)
    assert out_big.shape == (Bbig, num_nodes, bbx_size)

    print("KERNEL_OK")
</pallas_src>

<mosaic_0001>
module attributes {stable_mosaic.version = 11 : i64} {
  func.func @_fused_affine_kernel(%arg0: i32, %arg1: memref<8x81xf32, #tpu.memory_space<vmem>>, %arg2: memref<81x4xf32, #tpu.memory_space<vmem>>, %arg3: memref<1x4xf32, #tpu.memory_space<vmem>>, %arg4: memref<8x4xf32, #tpu.memory_space<vmem>>) attributes {dimension_semantics = [#tpu.dimension_semantics<parallel>], iteration_bounds = array<i64: 1>, scalar_prefetch = 0 : i64, scratch_operands = 0 : i64, tpu.core_type = #tpu.core_type<tc>, window_params = [{transform_indices = @transform_0, window_bounds = array<i64: 8, 81>}, {pipeline_mode = #tpu.pipeline_mode<synchronous>, transform_indices = @transform_1, window_bounds = array<i64: 81, 4>}, {pipeline_mode = #tpu.pipeline_mode<synchronous>, transform_indices = @transform_2, window_bounds = array<i64: 1, 4>}, {transform_indices = @transform_3, window_bounds = array<i64: 8, 4>}]} {
    %c0 = arith.constant 0 : index
    %c0_0 = arith.constant 0 : index
    %0 = vector.load %arg1[%c0, %c0_0] : memref<8x81xf32, #tpu.memory_space<vmem>>, vector<8x81xf32>
    %c0_1 = arith.constant 0 : index
    %c0_2 = arith.constant 0 : index
    %1 = vector.load %arg2[%c0_1, %c0_2] : memref<81x4xf32, #tpu.memory_space<vmem>>, vector<81x4xf32>
    %cst = arith.constant dense<0.000000e+00> : vector<8x4xf32>
    %2 = tpu.matmul %0, %1, %cst {dimension_numbers = #tpu.dot_dimension_numbers<[1], [0], [0], [1], [0, 0, 1, 1], [], []>} : vector<8x81xf32>, vector<81x4xf32>, vector<8x4xf32> -> vector<8x4xf32>
    %c0_3 = arith.constant 0 : index
    %c0_4 = arith.constant 0 : index
    %3 = vector.load %arg3[%c0_3, %c0_4] : memref<1x4xf32, #tpu.memory_space<vmem>>, vector<1x4xf32>
    %4 = vector.broadcast %3 : vector<1x4xf32> to vector<8x4xf32>
    %5 = arith.addf %2, %4 : vector<8x4xf32>
    %c0_5 = arith.constant 0 : index
    %c0_6 = arith.constant 0 : index
    %6 = vector.load %arg4[%c0_5, %c0_6] : memref<8x4xf32, #tpu.memory_space<vmem>>, vector<8x4xf32>
    tpu.vector_store %arg4[%c0_5, %c0_6], %5 {strides = array<i32>} : memref<8x4xf32, #tpu.memory_space<vmem>>, vector<8x4xf32>,
    return
  }
  func.func @transform_0(%arg0: i32) -> (i32, i32) {
    %c0_i32 = arith.constant 0 : i32
    %c0_i32_0 = arith.constant 0 : i32
    return %arg0, %c0_i32 : i32, i32
  }
  func.func @transform_1(%arg0: i32) -> (i32, i32) {
    %c0_i32 = arith.constant 0 : i32
    %c0_i32_0 = arith.constant 0 : i32
    %c0_i32_1 = arith.constant 0 : i32
    return %c0_i32, %c0_i32_0 : i32, i32
  }
  func.func @transform_2(%arg0: i32) -> (i32, i32) {
    %c0_i32 = arith.constant 0 : i32
    %c0_i32_0 = arith.constant 0 : i32
    %c0_i32_1 = arith.constant 0 : i32
    return %c0_i32, %c0_i32_0 : i32, i32
  }
  func.func @transform_3(%arg0: i32) -> (i32, i32) {
    %c0_i32 = arith.constant 0 : i32
    %c0_i32_0 = arith.constant 0 : i32
    return %arg0, %c0_i32 : i32, i32
  }
}

</mosaic_0001>

<bundles_post_ra>
// kernel: _forward_pallas.1
= control target key start
LH: loop header
LB: loop body
LE: loop exit
PB: predicated region body
PF: predicated region fallthrough
CT: control target
= control target key end

     0   :  { %vm34_vm0 = vcmask 1040384   ;;  %vm30_vm1 = vcmask 662528   ;;  %vm58_vm2 = vcmask 31744   ;;  %s129_s1 = inlined_call_operand.vmem [shape: f32[81,4], index: 1, kind: input, shape index: {}]   ;;  %s130_s2 = inlined_call_operand.vmem [shape: f32[1,4], index: 2, kind: input, shape index: {}]   ;;  %s131_s0 = inlined_call_operand.vmem [shape: f32[8,81], index: 0, kind: input, shape index: {}]   ;;  %s132_s3 = inlined_call_operand.vmem [shape: f32[8,4], index: 3, kind: output, shape index: {}]  }
   0x1   :  { %v25_v0 = vld [vmem:[%s129_s1 + $0x50] sm:$0x1]  ;;  %v24_v1 = vld [vmem:[%s129_s1 + $0x48] sm:$0xff]  ;;  %v23_v2 = vld [vmem:[%s129_s1 + $0x40] sm:$0xff] }
   0x2   :  { %64 = vmatpush.msk.msra.mxu0 %vm34_vm0, %v25_v0  ;;  %v22_v3 = vld [vmem:[%s129_s1 + $0x38] sm:$0xff]  ;;  %v21_v4 = vld [vmem:[%s129_s1 + $0x30] sm:$0xff]  ;;  %v20_v5 = vld [vmem:[%s129_s1 + $0x28] sm:$0xff] }
   0x3   :  { %v19_v6 = vld [vmem:[%s129_s1 + $0x20] sm:$0xff]  ;;  %v18_v7 = vld [vmem:[%s129_s1 + $0x18] sm:$0xff]  ;;  %v17_v8 = vld [vmem:[%s129_s1 + $0x10] sm:$0xff] }
   0x4   :  { %44 = vmatpush.msra.mxu0 %v24_v1  ;;  %v16_v9 = vld [vmem:[%s129_s1 + $0x8] sm:$0xff]  ;;  %v15_v10 = vld [vmem:[%s129_s1] sm:$0xff] }
   0x5   :  { %v14_v11 = vld [vmem:[%s131_s0] sm:$0xff] }
   0x6   :  { %45 = vmatpush.msra.mxu0 %v23_v2  ;;  %v66_v12 = vld [vmem:[%s130_s2] ss:$0 sm:$0xff] }
   0x8   :  { %46 = vmatpush.msra.mxu0 %v22_v3 }
   0xa   :  { %47 = vmatpush.msra.mxu0 %v21_v4 }
   0xc   :  { %48 = vmatpush.msra.mxu0 %v20_v5 }
   0xe   :  { %49 = vmatpush.msra.mxu0 %v19_v6 }
  0x10   :  { %50 = vmatpush.msra.mxu0 %v18_v7 }
  0x12   :  { %51 = vmatpush.msra.mxu0 %v17_v8 }
  0x14   :  { %52 = vmatpush.msra.mxu0 %v16_v9 }
  0x16   :  { %53 = vmatpush.msra.mxu0 %v15_v10 }
  0x17   :  { %65 = vmatmul.msk.f32.vlgmr.msra.gmra.mxu0 %vm30_vm1, %v14_v11 }
  0x94   :  { %v55_v13 = vpop.f32.mrf.mxu0 }
  0x95   :  { %v56_v14 = vadd.f32 %v66_v12, %v55_v13 }
  0x97   :  { %59 = vst.msk [vmem:[%s132_s3] sm:$0xff] %vm58_vm2, %v56_v14 }

</bundles_post_ra>
